<compile_context>
chip_gen: v7x
topology: tpu7x:2x2x1
jax: 0.10.0
libtpu: 0.0.40
codegen_flags: <defaults>
</compile_context>

<pallas_src>
import functools

import jax
import jax.numpy as jnp
from jax.experimental import pallas as pl
from jax.experimental.pallas import tpu as pltpu

MEAN = 0.1307
SCALE = 3.2457
_NEG_MEAN_SCALE = -MEAN * SCALE

_VMEM_LIMIT_BYTES = 32 << 20  # <= physical VMEM on every generation (v7x: 64 MiB)


def _pick_block_bytes() -> int:
    """Per-array block size in bytes, tuned per TPU generation."""
    try:
        kind = jax.devices()[0].device_kind.lower()
    except Exception:
        return 2 << 20
    if "v5 lite" in kind or "v5lite" in kind or "v5e" in kind:
        # v5e: ~820 GB/s HBM -> 2 MiB blocks already hide per-step overhead,
        # and 2 arrays x 2 buffers x 2 MiB = 8 MiB fits its 16 MiB default.
        return 2 << 20
    # v6e / v7x: 4 MiB blocks -> 16 MiB double-buffered in+out, fits 32 MiB.
    return 4 << 20


def _rows_kernel(x_ref, o_ref, *, rows_per_sample, r_tile):
    """Dense path: x viewed as (total_rows, 128); sample 0 = first rows_per_sample rows."""
    rt, lanes = x_ref.shape
    row0 = pl.program_id(0) * r_tile
    row = row0 + jax.lax.broadcasted_iota(jnp.int32, (rt, lanes), 0)
    bias = jnp.where(row < rows_per_sample,
                     jnp.float32(_NEG_MEAN_SCALE), jnp.float32(0.0))
    y = x_ref[...].astype(jnp.float32) * jnp.float32(SCALE) + bias
    o_ref[...] = y.astype(o_ref.dtype)


def _batch_kernel(x_ref, o_ref):
    """Ragged path: x viewed as (B, n_elem); sample 0 = sublane row 0."""
    bsz, lt = x_ref.shape
    row = jax.lax.broadcasted_iota(jnp.int32, (bsz, lt), 0)
    bias = jnp.where(row == 0, jnp.float32(_NEG_MEAN_SCALE), jnp.float32(0.0))
    y = x_ref[...].astype(jnp.float32) * jnp.float32(SCALE) + bias
    o_ref[...] = y.astype(o_ref.dtype)


def normalization(x: jax.Array, *, jnp_fallback_bytes: int = 0) -> jax.Array:
    """Pallas TPU implementation of the modified Normalization module.

    jnp_fallback_bytes: if > 0, inputs smaller than that many bytes skip the
    Pallas call (launch/grid overhead dominates for tiny tensors).  Disabled by
    default so the kernel path is always exercised.
    """
    orig_shape = x.shape
    B = orig_shape[0]
    n_elem = 1
    for d in orig_shape[1:]:
        n_elem *= d
    total = B * n_elem
    itemsize = jnp.dtype(x.dtype).itemsize

    if total == 0:
        return x
    if jnp_fallback_bytes and total * itemsize < jnp_fallback_bytes:
        iota = jax.lax.broadcasted_iota(jnp.int32, (B,) + (1,) * (x.ndim - 1), 0)
        bias = jnp.where(iota == 0, jnp.float32(_NEG_MEAN_SCALE), jnp.float32(0.0))
        return (x.astype(jnp.float32) * jnp.float32(SCALE) + bias).astype(x.dtype)

    block_bytes = _pick_block_bytes()
    sub_pack = max(8, 32 // itemsize)  # sublane packing: 8 f32 / 16 bf16 / 32 int8
    cost = pl.CostEstimate(flops=2 * total, transcendentals=0,
                           bytes_accessed=2 * total * itemsize)
    cparams = pltpu.CompilerParams(dimension_semantics=("parallel",),
                                   vmem_limit_bytes=_VMEM_LIMIT_BYTES)

    if n_elem % 128 == 0:
        # ---- Dense path: collapse batch into the row axis (free reshape) ----
        rows_per_sample = n_elem // 128
        total_rows = B * rows_per_sample
        x2 = x.reshape(total_rows, 128)

        r_tile = block_bytes // (128 * itemsize)
        r_tile = max(sub_pack, (r_tile // sub_pack) * sub_pack)
        if r_tile >= total_rows:
            r_tile = total_rows  # full extent (always legal)
        grid = (pl.cdiv(total_rows, r_tile),)

        out = pl.pallas_call(
            functools.partial(_rows_kernel,
                              rows_per_sample=rows_per_sample, r_tile=r_tile),
            out_shape=jax.ShapeDtypeStruct((total_rows, 128), x.dtype),
            grid=grid,
            in_specs=[pl.BlockSpec((r_tile, 128), lambda r: (r, 0))],
            out_specs=pl.BlockSpec((r_tile, 128), lambda r: (r, 0)),
            compiler_params=cparams,
            cost_estimate=cost,
            input_output_aliases={0: 0},
        )(x2)
        return out.reshape(orig_shape)

    # ---- Ragged path: (B, n_elem) view, lane-tiled grid, masked edge block ----
    x2 = x.reshape(B, n_elem)
    # VMEM footprint of a (B, lane_tile) block rounds B up to the sublane pack.
    sub_rows = -(-B // sub_pack) * sub_pack
    lane_tile = block_bytes // (sub_rows * itemsize)
    lane_tile = max(128, (lane_tile // 128) * 128)
    if lane_tile >= n_elem:
        lane_tile = n_elem  # single full-extent block (always legal)
    grid = (pl.cdiv(n_elem, lane_tile),)

    out = pl.pallas_call(
        _batch_kernel,
        out_shape=jax.ShapeDtypeStruct((B, n_elem), x.dtype),
        grid=grid,
        in_specs=[pl.BlockSpec((B, lane_tile), lambda j: (0, j))],
        out_specs=pl.BlockSpec((B, lane_tile), lambda j: (0, j)),
        compiler_params=cparams,
        cost_estimate=cost,
        input_output_aliases={0: 0},
    )(x2)
    return out.reshape(orig_shape)


def normalization_ref(x: jax.Array) -> jax.Array:
    """Pure-JAX reference matching the PyTorch semantics."""
    x0 = (x[0] - MEAN) * SCALE
    rest = x[1:] * SCALE
    return jnp.concatenate([x0[None], rest], axis=0)


if __name__ == "__main__":
    key = jax.random.PRNGKey(0)
    # NCHW input, small shapes: batch=2, channels=4, spatial=16x16
    x = jax.random.normal(key, (2, 4, 16, 16), dtype=jnp.float32)

    y = normalization(x)
    y = jax.block_until_ready(y)

    y_ref = normalization_ref(x)
    assert y.shape == x.shape and y.dtype == x.dtype
    assert jnp.allclose(y, y_ref, atol=1e-5, rtol=1e-5), "mismatch vs reference"

    print("KERNEL_OK")
</pallas_src>

<mosaic_0001>
module attributes {stable_mosaic.version = 11 : i64} {
  func.func @_rows_kernel(%arg0: i32, %arg1: memref<16x128xf32, #tpu.memory_space<vmem>>, %arg2: memref<16x128xf32, #tpu.memory_space<vmem>>) attributes {dimension_semantics = [#tpu.dimension_semantics<parallel>], iteration_bounds = array<i64: 1>, scalar_prefetch = 0 : i64, scratch_operands = 0 : i64, tpu.core_type = #tpu.core_type<tc>, window_params = [{transform_indices = @transform_0, window_bounds = array<i64: 16, 128>}, {transform_indices = @transform_1, window_bounds = array<i64: 16, 128>}]} {
    %c16_i32 = arith.constant 16 : i32
    %0 = arith.muli %arg0, %c16_i32 : i32
    %1 = tpu.iota {dimensions = array<i32: 0>} : vector<16x128xi32>
    %2 = vector.broadcast %0 : i32 to vector<16x128xi32>
    %3 = arith.addi %2, %1 : vector<16x128xi32>
    %c8_i32 = arith.constant 8 : i32
    %4 = vector.broadcast %c8_i32 : i32 to vector<16x128xi32>
    %5 = arith.cmpi slt, %3, %4 : vector<16x128xi32>
    %cst = arith.constant -4.242130e-01 : f32
    %cst_0 = arith.constant 0.000000e+00 : f32
    %6 = vector.broadcast %cst : f32 to vector<16x128xf32>
    %7 = vector.broadcast %cst_0 : f32 to vector<16x128xf32>
    %8 = arith.select %5, %6, %7 : vector<16x128xi1>, vector<16x128xf32>
    %c0 = arith.constant 0 : index
    %c0_1 = arith.constant 0 : index
    %9 = vector.load %arg1[%c0, %c0_1] : memref<16x128xf32, #tpu.memory_space<vmem>>, vector<16x128xf32>
    %cst_2 = arith.constant 3.245700e+00 : f32
    %10 = vector.broadcast %cst_2 : f32 to vector<16x128xf32>
    %11 = arith.mulf %9, %10 : vector<16x128xf32>
    %12 = arith.addf %11, %8 : vector<16x128xf32>
    %c0_3 = arith.constant 0 : index
    %c0_4 = arith.constant 0 : index
    %13 = vector.load %arg2[%c0_3, %c0_4] : memref<16x128xf32, #tpu.memory_space<vmem>>, vector<16x128xf32>
    tpu.vector_store %arg2[%c0_3, %c0_4], %12 {strides = array<i32>} : memref<16x128xf32, #tpu.memory_space<vmem>>, vector<16x128xf32>,
    return
  }
  func.func @transform_0(%arg0: i32) -> (i32, i32) {
    %c0_i32 = arith.constant 0 : i32
    %c0_i32_0 = arith.constant 0 : i32
    return %arg0, %c0_i32 : i32, i32
  }
  func.func @transform_1(%arg0: i32) -> (i32, i32) {
    %c0_i32 = arith.constant 0 : i32
    %c0_i32_0 = arith.constant 0 : i32
    return %arg0, %c0_i32 : i32, i32
  }
}

</mosaic_0001>

<bundles_post_ra>
// kernel: tpu_custom_call.1
= control target key start
LH: loop header
LB: loop body
LE: loop exit
PB: predicated region body
PF: predicated region fallthrough
CT: control target
= control target key end

     0   :  { %6 = vsyncpa [#allocation3], 0  ;;  %s155_s0 = inlined_call_operand.hbm [shape: f32[16,128], index: 0, kind: input, shape index: {}, may-alias: {0,1}]   ;;  %s156_s1 = inlined_call_operand.hbm [shape: f32[16,128], index: 1, kind: output, shape index: {}, may-alias: {0,1}]  }
   0x1   :  { %7 = vsyncpa [#allocation4], 0  ;;  %s111_s6 = smov [#allocation2]   ;;  %s63_s10 = scalar_lea.hbm %s155_s0, 256 }
   0x2   :  { %s13_s7 = sshll.u32 %s111_s6, 4  ;;  %p64_p0 = scmp.ne.s32.totalorder %s155_s0, %s63_s10  ;;  %s14_s7 = int_to_ptr.vmem [resolvable:$true] %s13_s7 }
   0x3   :  { %p67_p1 = scmp.lt.u32.totalorder %s63_s10, %s155_s0 }
   0x5   :  { %p69_p2 = pnand %p67_p1, %p64_p0 }
   0x7   :  { %72 = shalt.err (!%p69_p2)
}
   0x8   :  { %s73_s15 = scalar_lea.vmem %s14_s7, 256  ;;  %p78_p4 = scmp.lt.s32.totalorder %s14_s7, %s14_s7 }
   0x9   :  { %p74_p3 = scmp.ne.s32.totalorder %s14_s7, %s73_s15  ;;  %p79_p5 = scmp.lt.s32.totalorder %s73_s15, %s73_s15 }
   0xb   :  { %p80_p6 = por %p79_p5, %p78_p4 }
   0xd   :  { %p81_p7 = pnand %p80_p6, %p74_p3 }
   0xf   :  { %84 = shalt.err (!%p81_p7)
}
  0x10   :  { %s112_s16 = smov 128   ;;  %s113_s17 = smov 8  }
  0x11   :  { %19 = dma.hbm_to_vmem [thread:$0]  %s155_s0, 256, %s14_s7, [#allocation3], %s112_s16, %s112_s16, %s113_s17  }
  0x12   :  { %107 = dma.done.wait [#allocation3], 256  }
  0x13   :  { %108 = vsyncadd [#allocation3], 4294967040  ;;  %v34_v0 = vld [vmem:[#allocation2] sm:$0xff]  ;;  %v35_v1 = vld [vmem:[#allocation2 + $0x8] sm:$0xff]  ;;  %s114_s20 = smov [#allocation5]  }
  0x14   :  { %s47_s21 = sshll.u32 %s114_s20, 4  ;;  %v36_v2 = vmul.f32 3.2457, %v34_v0  ;;  %v37_v3 = vmul.f32 3.2457, %v35_v1  ;;  %s48_s21 = int_to_ptr.vmem [resolvable:$true] %s47_s21 }
  0x15   :  { %s85_s22 = scalar_lea.vmem %s48_s21, 256  ;;  %p90_p9 = scmp.lt.s32.totalorder %s48_s21, %s48_s21 }
  0x16   :  { %v38_v4 = vadd.f32 -0.424213, %v36_v2  ;;  %41 = vst [vmem:[#allocation5 + $0x8] sm:$0xff] %v37_v3  ;;  %p86_p8 = scmp.ne.s32.totalorder %s48_s21, %s85_s22  ;;  %p91_p10 = scmp.lt.s32.totalorder %s85_s22, %s85_s22 }
  0x18   :  { %40 = vst [vmem:[#allocation5] sm:$0xff] %v38_v4  ;;  %p92_p11 = por %p91_p10, %p90_p9 }
  0x1a   :  { %p93_p12 = pnand %p92_p11, %p86_p8 }
  0x1c   :  { %96 = shalt.err (!%p93_p12)
}
  0x1d   :  { %s97_s24 = scalar_lea.hbm %s156_s1, 256 }
  0x1e   :  { %p98_p13 = scmp.ne.s32.totalorder %s156_s1, %s97_s24  ;;  %p101_p0 = scmp.lt.u32.totalorder %s97_s24, %s156_s1 }
  0x20   :  { %p103_p1 = pnand %p101_p0, %p98_p13 }
  0x22   :  { %106 = shalt.err (!%p103_p1)
}
  0x23   :  { %53 = dma.vmem_to_hbm [thread:$0]  %s48_s21, 256, %s156_s1, [#allocation4], %s112_s16, %s112_s16, %s113_s17  }
  0x24   :  { %109 = dma.done.wait [#allocation4], 256  }
  0x25   :  { %110 = vsyncadd [#allocation4], 4294967040 }
  0x26   :  { %57 = vsyncpa [#allocation3], 1 }
  0x27   :  { %58 = vsyncpa [#allocation4], 1 }

</bundles_post_ra>
